<compile_context>
chip_gen: v5e
topology: v5e:2x2
jax: 0.10.0
libtpu: 0.0.40
codegen_flags: <defaults>
</compile_context>

<pallas_src>
import functools

import jax
import jax.numpy as jnp
from jax.experimental import pallas as pl
from jax.experimental.pallas import tpu as pltpu


def rgcn_kernel(num_layers, alpha, att_op,
                x_ref, adj_ref, mask_ref, *refs):
    """One graph per grid step.

    Refs (after batch-dim squeeze): x (N,F) f32, adj (N,N) bf16, mask (N,1) f32,
    W_0..W_{L-1} bf16, W_att bf16, b_att f32, W_ln bf16, b_ln f32, out (1, OW) f32.
    """
    w_gcn = refs[:num_layers]
    w_att_ref, b_att_ref, w_ln_ref, b_ln_ref, out_ref = refs[num_layers:]

    n_nodes = x_ref.shape[0]
    hp = w_ln_ref.shape[1]

    adj = adj_ref[...]                                    # (N, N) bf16 (cast in wrapper)
    mask = mask_ref[...]                                  # (N, 1) f32
    # Hoist the (N, Hp) mask broadcast out of the unrolled layer loop (no CSE in loops).
    mask_b = jnp.broadcast_to(mask, (n_nodes, hp))

    def gcn(h, w_ref):
        # GraphConvolution: relu(adj @ (dropout(h) @ W)); dropout == identity at eval.
        support = jnp.dot(h.astype(jnp.bfloat16), w_ref[...],
                          preferred_element_type=jnp.float32)
        agg = jnp.dot(adj, support.astype(jnp.bfloat16),
                      preferred_element_type=jnp.float32)
        return jax.nn.relu(agg)

    # Layer 0: feature_dim -> hidden. Remaining layers: residual hidden -> hidden.
    h = gcn(x_ref[...], w_gcn[0]) * mask_b
    for l in range(1, num_layers):                        # static unroll
        out = gcn(h, w_gcn[l]) * mask_b
        res = h if alpha == 1.0 else alpha * h
        h = res + out

    # Soft-attention readout (elementwise kept in f32).
    h_bf = h.astype(jnp.bfloat16)
    att = jax.nn.sigmoid(
        jnp.dot(h_bf, w_att_ref[...], preferred_element_type=jnp.float32)
        + b_att_ref[...])                                 # (N, 1)
    hl = jax.nn.relu(
        jnp.dot(h_bf, w_ln_ref[...], preferred_element_type=jnp.float32)
        + b_ln_ref[...])                                  # (N, Hp)
    g = hl * (att * mask)                                 # (N, Hp)

    s = jnp.sum(g, axis=0, keepdims=True)                 # (1, Hp)
    m = jnp.max(g, axis=0, keepdims=True)                 # (1, Hp)
    if att_op == "sum":
        out_ref[...] = s + m
    elif att_op == "concat":
        out_ref[...] = jnp.concatenate([s, m], axis=1)    # (1, 2*Hp)
    else:                                                 # 'mul' (module default)
        out_ref[...] = s * m


def _pad2(w, rows, cols):
    r, c = w.shape
    return jnp.pad(w, ((0, rows - r), (0, cols - c)))


def rgcn_forward(inputs, adj, mask, params, num_GNN_layers,
                 *, alpha_weight=1.0, att_op="mul"):
    B, N, F = inputs.shape
    H = params["w_gcn"][0].shape[1]
    Hp = pl.cdiv(H, 128) * 128                     # lane-dense hidden width
    OW = 2 * Hp if att_op == "concat" else Hp      # output slab width

    # One-time layout/dtype prep: bf16 MXU operands, zero-padded hidden dim.
    adj_bf = adj.astype(jnp.bfloat16)
    w_gcn = [_pad2(params["w_gcn"][0], F, Hp).astype(jnp.bfloat16)]
    for l in range(1, num_GNN_layers):
        w_gcn.append(_pad2(params["w_gcn"][l], Hp, Hp).astype(jnp.bfloat16))
    w_att = _pad2(params["w_att"], Hp, 1).astype(jnp.bfloat16)
    b_att = params["b_att"].astype(jnp.float32)                    # (1, 1)
    w_ln = _pad2(params["w_ln"], Hp, Hp).astype(jnp.bfloat16)
    b_ln = _pad2(params["b_ln"], 1, Hp).astype(jnp.float32)        # (1, Hp)
    weights = w_gcn + [w_att, b_att, w_ln, b_ln]

    in_specs = [
        pl.BlockSpec((pl.Squeezed(), N, F), lambda b: (b, 0, 0)),  # inputs
        pl.BlockSpec((pl.Squeezed(), N, N), lambda b: (b, 0, 0)),  # adj
        pl.BlockSpec((pl.Squeezed(), N, 1), lambda b: (b, 0, 0)),  # mask
    ] + [pl.BlockSpec(w.shape, lambda b: (0, 0)) for w in weights]  # shared weights

    out_spec = pl.BlockSpec((pl.Squeezed(), 1, OW), lambda b: (b, 0, 0))

    kernel = functools.partial(rgcn_kernel, num_GNN_layers,
                               float(alpha_weight), att_op)

    out = pl.pallas_call(
        kernel,
        out_shape=jax.ShapeDtypeStruct((B, 1, OW), jnp.float32),
        grid_spec=pltpu.PrefetchScalarGridSpec(
            num_scalar_prefetch=0,
            grid=(B,),
            in_specs=in_specs,
            out_specs=out_spec,
        ),
        compiler_params=pltpu.CompilerParams(
            dimension_semantics=("parallel",)),
    )(inputs, adj_bf, mask, *weights)

    out = out.reshape(B, OW)
    if att_op == "concat":
        return jnp.concatenate([out[:, :H], out[:, Hp:Hp + H]], axis=1)
    return out[:, :H]


def rgcn_reference(inputs, adj, mask, params, num_GNN_layers,
                   *, alpha_weight=1.0, att_op="mul"):
    """Pure-JAX f32 reference of the PyTorch RGCN.forward (eval mode)."""
    x = inputs
    for l in range(num_GNN_layers):
        out = jax.nn.relu(jnp.matmul(adj, jnp.matmul(x, params["w_gcn"][l]))) * mask
        x = out if l == 0 else alpha_weight * x + out
    att = jax.nn.sigmoid(jnp.matmul(x, params["w_att"]) + params["b_att"])
    xl = jax.nn.relu(jnp.matmul(x, params["w_ln"]) + params["b_ln"])
    g = att * xl * mask
    s = jnp.sum(g, axis=1)
    m = jnp.max(g, axis=1)
    if att_op == "sum":
        return s + m
    if att_op == "concat":
        return jnp.concatenate([s, m], axis=1)
    return s * m


def init_gcn_weight(key, fan_in, fan_out):
    """GraphConvolution.reset_parameters: U(-stdv, stdv), stdv = sqrt(6/(in+out))."""
    stdv = (6.0 / (fan_in + fan_out)) ** 0.5
    return jax.random.uniform(key, (fan_in, fan_out), jnp.float32, -stdv, stdv)


def init_linear(key, fan_in, fan_out):
    """Stand-in for torch.nn.Linear init; weight pre-transposed to (in, out), bias (1, out)."""
    kw, kb = jax.random.split(key)
    bound = 1.0 / (fan_in ** 0.5)
    w = jax.random.uniform(kw, (fan_in, fan_out), jnp.float32, -bound, bound)
    b = jax.random.uniform(kb, (1, fan_out), jnp.float32, -bound, bound)
    return w, b


if __name__ == "__main__":
    # Batch of graphs: batch=4, nodes=16, feature_dim_size=8, hidden_size=32, 2 GNN layers.
    B, N, F, H = 4, 16, 8, 32
    num_GNN_layers = 2

    key = jax.random.PRNGKey(0)
    keys = jax.random.split(key, 8)

    params = {}
    params["w_gcn"] = [init_gcn_weight(keys[0], F, H),
                       init_gcn_weight(keys[1], H, H)]
    params["w_att"], params["b_att"] = init_linear(keys[2], H, 1)   # soft_att
    params["w_ln"], params["b_ln"] = init_linear(keys[3], H, H)     # ln

    inputs = jax.random.normal(keys[4], (B, N, F), jnp.float32)

    # Symmetric row-normalized adjacency with self loops, per graph.
    a = (jax.random.uniform(keys[5], (B, N, N)) < 0.3).astype(jnp.float32)
    adj = jnp.minimum(a + jnp.swapaxes(a, 1, 2), 1.0) + jnp.eye(N, dtype=jnp.float32)
    adj = adj / jnp.clip(adj.sum(axis=-1, keepdims=True), 1.0, None)

    # Node validity mask: graph b has (8 + 2*b) valid nodes.
    valid = 8 + 2 * jnp.arange(B)
    mask = (jnp.arange(N)[None, :] < valid[:, None]).astype(jnp.float32)[..., None]

    out = rgcn_forward(inputs, adj, mask, params, num_GNN_layers,
                       alpha_weight=1.0, att_op="mul")
    out = jax.block_until_ready(out)

    ref = rgcn_reference(inputs, adj, mask, params, num_GNN_layers,
                         alpha_weight=1.0, att_op="mul")

    assert out.shape == (B, H)
    assert bool(jnp.all(jnp.isfinite(out)))
    # bf16 MXU inputs with f32 accumulation vs the pure-f32 reference.
    assert bool(jnp.allclose(out, ref, rtol=5e-2, atol=5e-2)), \
        float(jnp.max(jnp.abs(out - ref)))
    print("KERNEL_OK")
</pallas_src>

<mosaic_0001>
module attributes {stable_mosaic.version = 11 : i64} {
  func.func @rgcn_kernel(%arg0: i32, %arg1: memref<1x16x8xf32, #tpu.memory_space<vmem>>, %arg2: memref<1x16x16xbf16, #tpu.memory_space<vmem>>, %arg3: memref<1x16x1xf32, #tpu.memory_space<vmem>>, %arg4: memref<8x128xbf16, #tpu.memory_space<vmem>>, %arg5: memref<128x128xbf16, #tpu.memory_space<vmem>>, %arg6: memref<128x1xbf16, #tpu.memory_space<vmem>>, %arg7: memref<1x1xf32, #tpu.memory_space<vmem>>, %arg8: memref<128x128xbf16, #tpu.memory_space<vmem>>, %arg9: memref<1x128xf32, #tpu.memory_space<vmem>>, %arg10: memref<1x1x128xf32, #tpu.memory_space<vmem>>) attributes {dimension_semantics = [#tpu.dimension_semantics<parallel>], iteration_bounds = array<i64: 4>, scalar_prefetch = 0 : i64, scratch_operands = 0 : i64, tpu.core_type = #tpu.core_type<tc>, window_params = [{transform_indices = @transform_0, window_bounds = array<i64: 1, 16, 8>}, {transform_indices = @transform_1, window_bounds = array<i64: 1, 16, 16>}, {transform_indices = @transform_2, window_bounds = array<i64: 1, 16, 1>}, {pipeline_mode = #tpu.pipeline_mode<synchronous>, transform_indices = @transform_3, window_bounds = array<i64: 8, 128>}, {pipeline_mode = #tpu.pipeline_mode<synchronous>, transform_indices = @transform_4, window_bounds = array<i64: 128, 128>}, {pipeline_mode = #tpu.pipeline_mode<synchronous>, transform_indices = @transform_5, window_bounds = array<i64: 128, 1>}, {pipeline_mode = #tpu.pipeline_mode<synchronous>, transform_indices = @transform_6, window_bounds = array<i64: 1, 1>}, {pipeline_mode = #tpu.pipeline_mode<synchronous>, transform_indices = @transform_7, window_bounds = array<i64: 128, 128>}, {pipeline_mode = #tpu.pipeline_mode<synchronous>, transform_indices = @transform_8, window_bounds = array<i64: 1, 128>}, {transform_indices = @transform_9, window_bounds = array<i64: 1, 1, 128>}]} {
    %c0 = arith.constant 0 : index
    %c0_0 = arith.constant 0 : index
    %c0_1 = arith.constant 0 : index
    %0 = vector.load %arg2[%c0, %c0_0, %c0_1] : memref<1x16x16xbf16, #tpu.memory_space<vmem>>, vector<1x16x16xbf16>
    %1 = vector.shape_cast %0 : vector<1x16x16xbf16> to vector<16x16xbf16>
    %c0_2 = arith.constant 0 : index
    %c0_3 = arith.constant 0 : index
    %c0_4 = arith.constant 0 : index
    %2 = vector.load %arg3[%c0_2, %c0_3, %c0_4] : memref<1x16x1xf32, #tpu.memory_space<vmem>>, vector<1x16x1xf32>
    %3 = vector.shape_cast %2 : vector<1x16x1xf32> to vector<16x1xf32>
    %4 = vector.shape_cast %3 : vector<16x1xf32> to vector<16x1xf32>
    %5 = vector.broadcast %4 : vector<16x1xf32> to vector<16x128xf32>
    %c0_5 = arith.constant 0 : index
    %c0_6 = arith.constant 0 : index
    %c0_7 = arith.constant 0 : index
    %6 = vector.load %arg1[%c0_5, %c0_6, %c0_7] : memref<1x16x8xf32, #tpu.memory_space<vmem>>, vector<1x16x8xf32>
    %7 = vector.shape_cast %6 : vector<1x16x8xf32> to vector<16x8xf32>
    %8 = arith.truncf %7 : vector<16x8xf32> to vector<16x8xbf16>
    %c0_8 = arith.constant 0 : index
    %c0_9 = arith.constant 0 : index
    %9 = vector.load %arg4[%c0_8, %c0_9] : memref<8x128xbf16, #tpu.memory_space<vmem>>, vector<8x128xbf16>
    %cst = arith.constant dense<0.000000e+00> : vector<16x128xf32>
    %10 = tpu.matmul %8, %9, %cst {dimension_numbers = #tpu.dot_dimension_numbers<[1], [0], [0], [1], [0, 0, 1, 1], [], []>} : vector<16x8xbf16>, vector<8x128xbf16>, vector<16x128xf32> -> vector<16x128xf32>
    %11 = arith.truncf %10 : vector<16x128xf32> to vector<16x128xbf16>
    %cst_10 = arith.constant dense<0.000000e+00> : vector<16x128xf32>
    %12 = tpu.matmul %1, %11, %cst_10 {dimension_numbers = #tpu.dot_dimension_numbers<[1], [0], [0], [1], [0, 0, 1, 1], [], []>} : vector<16x16xbf16>, vector<16x128xbf16>, vector<16x128xf32> -> vector<16x128xf32>
    %cst_11 = arith.constant 0.000000e+00 : f32
    %13 = vector.broadcast %cst_11 : f32 to vector<16x128xf32>
    %14 = arith.maximumf %12, %13 : vector<16x128xf32>
    %15 = arith.mulf %14, %5 : vector<16x128xf32>
    %16 = arith.truncf %15 : vector<16x128xf32> to vector<16x128xbf16>
    %c0_12 = arith.constant 0 : index
    %c0_13 = arith.constant 0 : index
    %17 = vector.load %arg5[%c0_12, %c0_13] : memref<128x128xbf16, #tpu.memory_space<vmem>>, vector<128x128xbf16>
    %cst_14 = arith.constant dense<0.000000e+00> : vector<16x128xf32>
    %18 = tpu.matmul %16, %17, %cst_14 {dimension_numbers = #tpu.dot_dimension_numbers<[1], [0], [0], [1], [0, 0, 1, 1], [], []>} : vector<16x128xbf16>, vector<128x128xbf16>, vector<16x128xf32> -> vector<16x128xf32>
    %19 = arith.truncf %18 : vector<16x128xf32> to vector<16x128xbf16>
    %cst_15 = arith.constant dense<0.000000e+00> : vector<16x128xf32>
    %20 = tpu.matmul %1, %19, %cst_15 {dimension_numbers = #tpu.dot_dimension_numbers<[1], [0], [0], [1], [0, 0, 1, 1], [], []>} : vector<16x16xbf16>, vector<16x128xbf16>, vector<16x128xf32> -> vector<16x128xf32>
    %cst_16 = arith.constant 0.000000e+00 : f32
    %21 = vector.broadcast %cst_16 : f32 to vector<16x128xf32>
    %22 = arith.maximumf %20, %21 : vector<16x128xf32>
    %23 = arith.mulf %22, %5 : vector<16x128xf32>
    %24 = arith.addf %15, %23 : vector<16x128xf32>
    %25 = arith.truncf %24 : vector<16x128xf32> to vector<16x128xbf16>
    %c0_17 = arith.constant 0 : index
    %c0_18 = arith.constant 0 : index
    %26 = vector.load %arg6[%c0_17, %c0_18] : memref<128x1xbf16, #tpu.memory_space<vmem>>, vector<128x1xbf16>
    %cst_19 = arith.constant dense<0.000000e+00> : vector<16x1xf32>
    %27 = tpu.matmul %25, %26, %cst_19 {dimension_numbers = #tpu.dot_dimension_numbers<[1], [0], [0], [1], [0, 0, 1, 1], [], []>} : vector<16x128xbf16>, vector<128x1xbf16>, vector<16x1xf32> -> vector<16x1xf32>
    %c0_20 = arith.constant 0 : index
    %c0_21 = arith.constant 0 : index
    %28 = vector.load %arg7[%c0_20, %c0_21] : memref<1x1xf32, #tpu.memory_space<vmem>>, vector<1x1xf32>
    %29 = vector.broadcast %28 : vector<1x1xf32> to vector<16x1xf32>
    %30 = arith.addf %27, %29 : vector<16x1xf32>
    %31 = arith.negf %30 : vector<16x1xf32>
    %32 = math.exp %31 : vector<16x1xf32>
    %cst_22 = arith.constant 1.000000e+00 : f32
    %33 = vector.broadcast %cst_22 : f32 to vector<16x1xf32>
    %34 = arith.addf %33, %32 : vector<16x1xf32>
    %35 = arith.divf %33, %34 : vector<16x1xf32>
    %c0_23 = arith.constant 0 : index
    %c0_24 = arith.constant 0 : index
    %36 = vector.load %arg8[%c0_23, %c0_24] : memref<128x128xbf16, #tpu.memory_space<vmem>>, vector<128x128xbf16>
    %cst_25 = arith.constant dense<0.000000e+00> : vector<16x128xf32>
    %37 = tpu.matmul %25, %36, %cst_25 {dimension_numbers = #tpu.dot_dimension_numbers<[1], [0], [0], [1], [0, 0, 1, 1], [], []>} : vector<16x128xbf16>, vector<128x128xbf16>, vector<16x128xf32> -> vector<16x128xf32>
    %c0_26 = arith.constant 0 : index
    %c0_27 = arith.constant 0 : index
    %38 = vector.load %arg9[%c0_26, %c0_27] : memref<1x128xf32, #tpu.memory_space<vmem>>, vector<1x128xf32>
    %39 = vector.broadcast %38 : vector<1x128xf32> to vector<16x128xf32>
    %40 = arith.addf %37, %39 : vector<16x128xf32>
    %cst_28 = arith.constant 0.000000e+00 : f32
    %41 = vector.broadcast %cst_28 : f32 to vector<16x128xf32>
    %42 = arith.maximumf %40, %41 : vector<16x128xf32>
    %43 = arith.mulf %35, %3 : vector<16x1xf32>
    %44 = vector.broadcast %43 : vector<16x1xf32> to vector<16x128xf32>
    %45 = arith.mulf %42, %44 : vector<16x128xf32>
    %cst_29 = arith.constant dense<0.000000e+00> : vector<128xf32>
    %46 = vector.multi_reduction <add>, %45, %cst_29 [0] : vector<16x128xf32> to vector<128xf32>
    %47 = vector.shape_cast %46 : vector<128xf32> to vector<1x128xf32>
    %cst_30 = arith.constant dense<0xFF800000> : vector<128xf32>
    %48 = vector.multi_reduction <maximumf>, %45, %cst_30 [0] : vector<16x128xf32> to vector<128xf32>
    %49 = vector.shape_cast %48 : vector<128xf32> to vector<1x128xf32>
    %50 = arith.mulf %47, %49 : vector<1x128xf32>
    %c0_31 = arith.constant 0 : index
    %c0_32 = arith.constant 0 : index
    %c0_33 = arith.constant 0 : index
    %51 = vector.load %arg10[%c0_31, %c0_32, %c0_33] : memref<1x1x128xf32, #tpu.memory_space<vmem>>, vector<1x1x128xf32>
    %52 = vector.shape_cast %51 : vector<1x1x128xf32> to vector<1x128xf32>
    %53 = vector.shape_cast %50 : vector<1x128xf32> to vector<1x1x128xf32>
    tpu.vector_store %arg10[%c0_31, %c0_32, %c0_33], %53 {strides = array<i32>} : memref<1x1x128xf32, #tpu.memory_space<vmem>>, vector<1x1x128xf32>,
    return
  }
  func.func @transform_0(%arg0: i32) -> (i32, i32, i32) {
    %c0_i32 = arith.constant 0 : i32
    %c0_i32_0 = arith.constant 0 : i32
    %c0_i32_1 = arith.constant 0 : i32
    return %arg0, %c0_i32, %c0_i32_0 : i32, i32, i32
  }
  func.func @transform_1(%arg0: i32) -> (i32, i32, i32) {
    %c0_i32 = arith.constant 0 : i32
    %c0_i32_0 = arith.constant 0 : i32
    %c0_i32_1 = arith.constant 0 : i32
    return %arg0, %c0_i32, %c0_i32_0 : i32, i32, i32
  }
  func.func @transform_2(%arg0: i32) -> (i32, i32, i32) {
    %c0_i32 = arith.constant 0 : i32
    %c0_i32_0 = arith.constant 0 : i32
    %c0_i32_1 = arith.constant 0 : i32
    return %arg0, %c0_i32, %c0_i32_0 : i32, i32, i32
  }
  func.func @transform_3(%arg0: i32) -> (i32, i32) {
    %c0_i32 = arith.constant 0 : i32
    %c0_i32_0 = arith.constant 0 : i32
    %c0_i32_1 = arith.constant 0 : i32
    return %c0_i32, %c0_i32_0 : i32, i32
  }
  func.func @transform_4(%arg0: i32) -> (i32, i32) {
    %c0_i32 = arith.constant 0 : i32
    %c0_i32_0 = arith.constant 0 : i32
    %c0_i32_1 = arith.constant 0 : i32
    return %c0_i32, %c0_i32_0 : i32, i32
  }
  func.func @transform_5(%arg0: i32) -> (i32, i32) {
    %c0_i32 = arith.constant 0 : i32
    %c0_i32_0 = arith.constant 0 : i32
    %c0_i32_1 = arith.constant 0 : i32
    return %c0_i32, %c0_i32_0 : i32, i32
  }
  func.func @transform_6(%arg0: i32) -> (i32, i32) {
    %c0_i32 = arith.constant 0 : i32
    %c0_i32_0 = arith.constant 0 : i32
    %c0_i32_1 = arith.constant 0 : i32
    return %c0_i32, %c0_i32_0 : i32, i32
  }
  func.func @transform_7(%arg0: i32) -> (i32, i32) {
    %c0_i32 = arith.constant 0 : i32
    %c0_i32_0 = arith.constant 0 : i32
    %c0_i32_1 = arith.constant 0 : i32
    return %c0_i32, %c0_i32_0 : i32, i32
  }
  func.func @transform_8(%arg0: i32) -> (i32, i32) {
    %c0_i32 = arith.constant 0 : i32
    %c0_i32_0 = arith.constant 0 : i32
    %c0_i32_1 = arith.constant 0 : i32
    return %c0_i32, %c0_i32_0 : i32, i32
  }
  func.func @transform_9(%arg0: i32) -> (i32, i32, i32) {
    %c0_i32 = arith.constant 0 : i32
    %c0_i32_0 = arith.constant 0 : i32
    %c0_i32_1 = arith.constant 0 : i32
    return %arg0, %c0_i32, %c0_i32_0 : i32, i32, i32
  }
}

</mosaic_0001>

<bundles_post_ra>
// kernel: tpu_custom_call.1
= control target key start
LH: loop header
LB: loop body
LE: loop exit
PB: predicated region body
PF: predicated region fallthrough
CT: control target
= control target key end

     0   :  { %s1362_s0 = inlined_call_operand.vmem [shape: f32[4,16,8], index: 0, kind: input, shape index: {}]   ;;  %s1363_s1 = inlined_call_operand.vmem [shape: bf16[4,16,16], index: 1, kind: input, shape index: {}]   ;;  %s1364_s2 = inlined_call_operand.vmem [shape: f32[4,16,1], index: 2, kind: input, shape index: {}]   ;;  %s1365_s3 = inlined_call_operand.vmem [shape: bf16[8,128], index: 3, kind: input, shape index: {}]   ;;  %s1366_s4 = inlined_call_operand.vmem [shape: bf16[128,128], index: 4, kind: input, shape index: {}]   ;;  %s1367_s5 = inlined_call_operand.vmem [shape: bf16[128,1], index: 5, kind: input, shape index: {}]   ;;  %s1368_s6 = inlined_call_operand.<no memory space> [shape: f32[1,1], index: 6, kind: input, shape index: {}]   ;;  %s1369_s7 = inlined_call_operand.vmem [shape: bf16[128,128], index: 7, kind: input, shape index: {}]   ;;  %s1370_s8 = inlined_call_operand.vmem [shape: f32[1,128], index: 8, kind: input, shape index: {}]   ;;  %s1371_s9 = inlined_call_operand.hbm [shape: f32[4,1,128], index: 9, kind: output, shape index: {}]  }
   0x1   :  { %v14_v0 = vstv %s1368_s6 }
   0x2   :  { %15 = vst [vmem:[#allocation2] sm:$0x1] %v14_v0 }
   0x3   :  { %16 = vsyncpa [#allocation4], 0 }
   0x4   :  { %18 = vsyncpa [#allocation4 + $0x1], 0  ;;  %s1183_s11 = smov 0   ;;  %s1185_s12 = smov 0  }
   0x5   :  { %s1187_s13 = smov 0   ;;  %s1189_s14 = smov 0  }
   0x6 LB: > { %s1204_s6 = sadd.s32 4294967295, %s1127_s14   ;;  %s868_s15 = sadd.s32 4294967294, %s1127_s14   ;;  %s1127_s14 = sphi %s1189_s14, %s1377_s14   ;;  %s1123_s13 = sphi %s1187_s13, %s1376_s13   ;;  %s1119_s12 = sphi %s1185_s12, %s1375_s12   ;;  %s1115_s11 = sphi %s1183_s11, %s1374_s11  }
   0x7   : > { %s1208_s16 = sadd.s32 1, %s1127_s14   ;;  %s235_s17 = sadd.s32 1, %s1123_s13 }
   0x8   : > { %s232_s18 = ssub.s32 %s1127_s14, %s1208_s16  ;;  %p245_p0 = scmp.ne.s32.totalorder %s1123_s13, %s1119_s12 }
   0x9   : > { %p233_p1 = scmp.eq.s32.totalorder %s232_s18, 0  ;;  %p246_p2 = scmp.eq.s32.totalorder %s1204_s6, 3 }
   0xa   : > { %p251_p3 = scmp.ne.s32.totalorder %s1119_s12, %s1115_s11  ;;  %p252_p4 = scmp.eq.s32.totalorder %s868_s15, 3 }
   0xb   : > { %s1219_s19 = scalar_select %p233_p1, %s1123_s13, %s235_s17  }
   0xc   : > { %p1221_p5 = por %p246_p2, %p245_p0  ;;  %p1225_p6 = por %p252_p4, %p251_p3 }
   0xd   : > { %p871_p7 = scmp.ge.s32.totalorder %s1127_s14, 1  ;;  %p312_p8 = scmp.lt.s32.totalorder %s1127_s14, 5 }
   0xf   : > { %p313_p9 = pnand %p871_p7, %p312_p8 }
  0x10   : > { %p357_p10 = scmp.lt.s32.totalorder (!%p313_p9), %s1204_s6, 3  ;;  %s355_s18 = sand.u32 (!%p313_p9), 1, %s1119_s12  }
  0x11   : > { %316 = sbr.rel (%p313_p9) target bundleno = 909 (0x38d), region = 56  ;;  %s785_s26 = scalar_lea.hbm (!%p313_p9), %s1371_s9, %s1204_s6 }
  0x12   : > { %s1085_s17 = scalar_lea.hbm (!%p313_p9), %s1371_s9, 4 }
  0x16   : > { %v390_v1 = vld [vmem:[%s1365_s3] sm:$0xf]  ;;  %vm395_vm0 = vcmask 1043456   ;;  %s358_s24 = scalar_select %p357_p10, %s1204_s6, 3  ;;  %vm391_vm1 = vcmask 64512   ;;  %v996_v7 = vld [vmem:[%s1366_s4 + $0x38] sm:$0xff] }
  0x17   : > { %v397_v2 = vsel %vm395_vm0, %v390_v1, 0  ;;  %v1129_v8 = vmov 0   ;;  %506 = vmatpush.bf16.msra.mxu2 %v996_v7  ;;  %v995_v9 = vld [vmem:[%s1366_s4 + $0x30] sm:$0xff]  ;;  %v994_v10 = vld [vmem:[%s1366_s4 + $0x28] sm:$0xff]  ;;  %vm419_vm2 = vcmask 130048   ;;  %v993_v16 = vld [vmem:[%s1366_s4 + $0x20] sm:$0xff] }
  0x18   : > { %406 = vmatpush.bf16.msra.mxu3 %v397_v2  ;;  %s985_s25 = sshll.u32 %s358_s24, 4  ;;  %1053 = vset.pattern.permute.xlu0 %v1129_v8  ;;  %v992_v17 = vld [vmem:[%s1366_s4 + $0x18] sm:$0xff]  ;;  %v991_v18 = vld [vmem:[%s1366_s4 + $0x10] sm:$0xff]  ;;  %v990_v19 = vld [vmem:[%s1366_s4 + $0x8] sm:$0xff] }
  0x19   : > { %s361_s28 = scalar_lea.vmem %s1362_s0, %s985_s25  ;;  %s371_s10 = scalar_lea.vmem %s1364_s2, %s985_s25  ;;  %1054 = vset.pattern.permute.xlu1 %v1129_v8  ;;  %v989_v20 = vld [vmem:[%s1366_s4] sm:$0xff]  ;;  %v1004_v30 = vld [vmem:[%s1367_s5 + $0x38] sm:$0xff]  ;;  %v1003_v32 = vld [vmem:[%s1367_s5 + $0x30] sm:$0xff] }
  0x1a   : > { %v387_v3 = vld [vmem:[%s361_s28] sm:$0xff]  ;;  %v388_v4 = vld [vmem:[%s361_s28 + $0x8] sm:$0xff]  ;;  %s986_s25 = sshll.u32 %s358_s24, 3  ;;  %v1012_v31 = vld [vmem:[%s1369_s7 + $0x38] sm:$0xff]  ;;  %610 = vmatpush.bf16.msra.mxu0 %v1004_v30  ;;  %s789_s28 = sshll.u32 %s785_s26, 4  ;;  %s790_s28 = int_to_ptr.hbm [resolvable:$true] %s789_s28 }
  0x1b   : > { %v389_v5 = vpack.c.bf16 %v388_v4, %v387_v3  ;;  %v1242_v6 = vld [vmem:[%s371_s10] sm:$0xff]  ;;  %507 = vmatpush.bf16.msra.mxu2 %v995_v9  ;;  %v1254_v11 = vld [vmem:[%s371_s10 + $0x8] sm:$0xff]  ;;  %s366_s29 = scalar_lea.vmem %s1363_s1, %s986_s25  ;;  %v1011_v33 = vld [vmem:[%s1369_s7 + $0x30] sm:$0xff]  ;;  %s356_s25 = scalar_lea.vmem [#allocation3], %s355_s18 }
  0x1c   : > { %379 = vperm.xlu0 %1053, %v1242_v6   ;;  %v988_v15 = vld [vmem:[%s366_s29] sm:$0xff]  ;;  %v1002_v34 = vld [vmem:[%s1367_s5 + $0x28] sm:$0xff]  ;;  %v1000_v41 = vld [vmem:[%s1367_s5 + $0x18] sm:$0xff]  ;;  %s787_s27 = sshll.u32 %s356_s25, 4  ;;  %s777_s29 = scalar_lea.sflag [#allocation4], %s355_s18  ;;  %s788_s27 = int_to_ptr.vmem [resolvable:$true] %s787_s27 }
  0x1d   : > { %878 = vmatmul.msk.bf16.vlgmr.msra.gmra.mxu3 %vm391_vm1, %v389_v5  ;;  %v1010_v35 = vld [vmem:[%s1369_s7 + $0x28] sm:$0xff]  ;;  %v1001_v36 = vld [vmem:[%s1367_s5 + $0x20] sm:$0xff]  ;;  %v1008_v42 = vld [vmem:[%s1369_s7 + $0x18] sm:$0xff]  ;;  %s1079_s30 = sshra.s32 %s790_s28, 4  ;;  %s1080_s30 = int_to_ptr.hbm [resolvable:$true] %s1079_s30 }
  0x1e   : > { %611 = vmatpush.bf16.msra.mxu0 %v1003_v32  ;;  %v1009_v37 = vld [vmem:[%s1369_s7 + $0x20] sm:$0xff]  ;;  %v999_v43 = vld [vmem:[%s1367_s5 + $0x10] sm:$0xff]  ;;  %v998_v45 = vld [vmem:[%s1367_s5 + $0x8] sm:$0xff]  ;;  %s1081_s15 = scalar_lea.hbm %s1080_s30, 1  ;;  %p1086_p0 = scmp.lt.s32.totalorder %s1080_s30, %s1371_s9 }
  0x1f   : > { %508 = vmatpush.bf16.msra.mxu2 %v994_v10  ;;  %v1007_v44 = vld [vmem:[%s1369_s7 + $0x10] sm:$0xff]  ;;  %v1006_v46 = vld [vmem:[%s1369_s7 + $0x8] sm:$0xff]  ;;  %v997_v47 = vld [vmem:[%s1367_s5] sm:$0xff]  ;;  %p1082_p11 = scmp.ne.s32.totalorder %s1080_s30, %s1081_s15  ;;  %p1087_p1 = scmp.lt.s32.totalorder %s1085_s17, %s1081_s15 }
  0x20   : > { %v1005_v48 = vld [vmem:[%s1369_s7] sm:$0xff] }
  0x21   : > { %v1055_v58 = vld [vmem:[#allocation2] ss:$0 sm:$0xff]  ;;  %p1083_p12 = pnand %p1082_p11, %p1221_p5  ;;  %p1088_p2 = por %p1087_p1, %p1086_p0 }
  0x22   : > { %612 = vmatpush.bf16.msra.mxu0 %v1002_v34 }
  0x23   : > { %509 = vmatpush.bf16.msra.mxu2 %v993_v16  ;;  %p1084_p13 = pneg %p1083_p12 }
  0x24   : > { %384 = vperm.xlu0 %1053, %v1254_v11  }
  0x25   : > { %p1089_p3 = pnand %p1088_p2, %p1084_p13 }
  0x26   : > { %613 = vmatpush.bf16.msra.mxu0 %v1001_v36 }
  0x27   : > { %510 = vmatpush.bf16.msra.mxu2 %v992_v17 }
  0x2a   : > { %614 = vmatpush.bf16.msra.mxu0 %v1000_v41 }
  0x2b   : > { %511 = vmatpush.bf16.msra.mxu2 %v991_v18 }
  0x2e   : > { %615 = vmatpush.bf16.msra.mxu0 %v999_v43 }
  0x2f   : > { %512 = vmatpush.bf16.msra.mxu2 %v990_v19 }
  0x32   : > { %616 = vmatpush.bf16.msra.mxu0 %v998_v45 }
  0x33   : > { %513 = vmatpush.bf16.msra.mxu2 %v989_v20 }
  0x36   : > { %617 = vmatpush.bf16.msra.mxu0 %v997_v47 }
  0x8e   : > { %v380_v21 = vpop.permute.xlu0 %379 }
  0x96   : > { %v385_v26 = vpop.permute.xlu0 %384 }
  0xa0   : > { %v408_v12 = vpop.f32.mrf.mxu3 }
  0xa8   : > { %v410_v13 = vpop.f32.mrf.mxu3 }
  0xa9   : > { %v413_v14 = vpack.c.bf16 %v410_v13, %v408_v12 }
  0xab   : > { %430 = vmatpush.bf16.msra.mxu1 %v413_v14 }
  0xae   : > { %883 = vmatmul.msk.bf16.vlgmr.msra.gmra.mxu1 %vm419_vm2, %v988_v15 }
  0xaf   : > { %730 = vmatpush.bf16.msrb.mxu1 %v1012_v31 }
  0xb3   : > { %731 = vmatpush.bf16.msrb.mxu1 %v1011_v33 }
  0xb7   : > { %732 = vmatpush.bf16.msrb.mxu1 %v1010_v35 }
  0xbb   : > { %733 = vmatpush.bf16.msrb.mxu1 %v1009_v37 }
  0xbf   : > { %734 = vmatpush.bf16.msrb.mxu1 %v1008_v42 }
  0xc3   : > { %735 = vmatpush.bf16.msrb.mxu1 %v1007_v44 }
  0xc7   : > { %736 = vmatpush.bf16.msrb.mxu1 %v1006_v46 }
  0xcb   : > { %737 = vmatpush.bf16.msrb.mxu1 %v1005_v48 }
 0x12b   : > { %v432_v22 = vpop.f32.mrf.mxu1 }
 0x12c   : > { %v437_v23 = vmax.f32 %v432_v22, 0.0 }
 0x12e   : > { %v439_v27 = vmul.f32 %v437_v23, %v380_v21 }
 0x133   : > { %v434_v24 = vpop.f32.mrf.mxu1 }
 0x134   : > { %v438_v25 = vmax.f32 %v434_v24, 0.0 }
 0x136   : > { %v440_v28 = vmul.f32 %v438_v25, %v385_v26 }
 0x138   : > { %v441_v29 = vpack.c.bf16 %v440_v28, %v439_v27 }
 0x13a   : > { %514 = vmatmul.bf16.vlgmr.msra.gmra.mxu2 %v441_v29 }
 0x1bd   : > { %v515_v38 = vpop.f32.mrf.mxu2 }
 0x1c5   : > { %v517_v39 = vpop.f32.mrf.mxu2 }
 0x1c6   : > { %v520_v40 = vpack.c.bf16 %v517_v39, %v515_v38 }
 0x1c8   : > { %528 = vmatpush.bf16.msrb.mxu3 %v520_v40 }
 0x1cb   : > { %916 = vmatmul.msk.bf16.vlgmr.msrb.gmra.mxu3 %vm419_vm2, %v988_v15 }
 0x24e   : > { %v530_v49 = vpop.f32.mrf.mxu3 }
 0x24f   : > { %v535_v50 = vmax.f32 %v530_v49, 0.0 }
 0x251   : > { %v537_v52 = vmul.f32 %v535_v50, %v380_v21 }
 0x253   : > { %v539_v55 = vadd.f32 %v537_v52, %v439_v27 }
 0x256   : > { %v532_v51 = vpop.f32.mrf.mxu3 }
 0x257   : > { %v536_v53 = vmax.f32 %v532_v51, 0.0 }
 0x259   : > { %v538_v54 = vmul.f32 %v536_v53, %v385_v26 }
 0x25b   : > { %v540_v56 = vadd.f32 %v538_v54, %v440_v28 }
 0x25d   : > { %v541_v57 = vpack.c.bf16 %v540_v56, %v539_v55 }
 0x25f   : > { %618 = vmatmul.bf16.vlgmr.msra.gmra.mxu0 %v541_v57  ;;  %738 = vmatmul.bf16.vlgmr.msrb.gmra.mxu1 %v541_v57 }
 0x2dc   : > { %v619_v59 = vpop.f32.mrf.mxu0  ;;  %v739_v29 = vpop.f32.mrf.mxu1 }
 0x2dd   : > { %v620_v60 = vadd.f32 %v1055_v58, %v619_v59 }
 0x2df   : > { %v949_v61 = vmul.f32 -1.442695, %v620_v60 }
 0x2e1   : > { %1057 = vpow2.f32 %v949_v61 }
 0x2e4   : > { %v621_v62 = vpop.f32.mrf.mxu0  ;;  %v741_v30 = vpop.f32.mrf.mxu1 }
 0x2e5   : > { %v622_v63 = vadd.f32 %v1055_v58, %v621_v62 }
 0x2e7   : > { %v1058_v0 = vpop.eup %1057  ;;  %v950_v1 = vmul.f32 -1.442695, %v622_v63 }
 0x2e8   : > { %v630_v2 = vadd.f32 1.0, %v1058_v0 }
 0x2e9   : > { %1059 = vpow2.f32 %v950_v1 }
 0x2ea   : > { %1061 = vrcp.f32 %v630_v2  ;;  %v643_v9 = vand.u32 2147483648, %v630_v2  ;;  %v641_v12 = vand.u32 2147483647, %v630_v2  ;;  %vm637_vm4 = vweird.f32 %v630_v2 }
 0x2ec   : > { %v644_v15 = vor.u32 1.1754944e-38, %v643_v9  ;;  %vm642_vm6 = vcmp.eq.f32.partialorder %v641_v12, 8.507059e+37 }
 0x2ef   : > { %v1060_v3 = vpop.eup %1059 }
 0x2f0   : > { %v1062_v4 = vpop.eup %1061  ;;  %v631_v5 = vadd.f32 1.0, %v1060_v3 }
 0x2f1   : > { %v633_v7 = vmul.f32 %v1062_v4, %v630_v2  ;;  %vm638_vm3 = vweird.f32 %v1062_v4 }
 0x2f2   : > { %1063 = vrcp.f32 %v631_v5  ;;  %vm639_vm5 = vmor %vm637_vm4, %vm638_vm3  ;;  %v658_v21 = vand.u32 2147483648, %v631_v5  ;;  %v656_v23 = vand.u32 2147483647, %v631_v5  ;;  %vm652_vm8 = vweird.f32 %v631_v5 }
 0x2f3   : > { %v634_v8 = vsub.f32 1.0, %v633_v7 }
 0x2f4   : > { %v659_v25 = vor.u32 1.1754944e-38, %v658_v21  ;;  %vm657_vm10 = vcmp.eq.f32.partialorder %v656_v23, 8.507059e+37 }
 0x2f5   : > { %v635_v10 = vmul.f32 %v1062_v4, %v634_v8 }
 0x2f7   : > { %v636_v13 = vadd.f32 %v1062_v4, %v635_v10 }
 0x2f8   : > { %v1064_v14 = vpop.eup %1063 }
 0x2f9   : > { %v648_v16 = vmul.f32 %v1064_v14, %v631_v5  ;;  %v640_v17 = vsel %vm639_vm5, %v1062_v4, %v636_v13  ;;  %vm653_vm7 = vweird.f32 %v1064_v14 }
 0x2fa   : > { %v645_v18 = vsel %vm642_vm6, %v644_v15, %v640_v17  ;;  %vm654_vm9 = vmor %vm652_vm8, %vm653_vm7 }
 0x2fb   : > { %v746_v19 = vmul.f32 %v645_v18, %v1242_v6  ;;  %v649_v20 = vsub.f32 1.0, %v648_v16  ;;  %v1056_v6 = vld [vmem:[%s1370_s8] ss:$0 sm:$0xff] }
 0x2fc   : > { %v740_v32 = vadd.f32 %v1056_v6, %v739_v29  ;;  %v742_v33 = vadd.f32 %v1056_v6, %v741_v30 }
 0x2fd   : > { %750 = vperm.xlu1 %1054, %v746_v19   ;;  %v650_v22 = vmul.f32 %v1064_v14, %v649_v20 }
 0x2fe   : > { %v744_v34 = vmax.f32 %v740_v32, 0.0  ;;  %v745_v35 = vmax.f32 %v742_v33, 0.0 }
 0x2ff   : > { %v651_v24 = vadd.f32 %v1064_v14, %v650_v22 }
 0x301   : > { %v655_v26 = vsel %vm654_vm9, %v1064_v14, %v651_v24 }
 0x302   : > { %v660_v27 = vsel %vm657_vm10, %v659_v25, %v655_v26 }
 0x303   : > { %v747_v28 = vmul.f32 %v660_v27, %v1254_v11 }
 0x305   : > { %755 = vperm.xlu1 %1054, %v747_v28  }
 0x36f   : > { %v751_v31 = vpop.permute.xlu1 %750 }
 0x370   : > { %v758_v37 = vmul.f32 %v751_v31, %v744_v34 }
 0x377   : > { %v756_v36 = vpop.permute.xlu1 %755 }
 0x378   : > { %v759_v38 = vmul.f32 %v756_v36, %v745_v35 }
 0x37a   : > { %v760_v39 = vadd.f32 %v759_v38, %v758_v37  ;;  %v767_v40 = vmax.f32 %v758_v37, %v759_v38 }
 0x37c   : > { %v761_v11 = vrot.slane %v760_v39, 4  ;;  %v768_v41 = vrot.slane %v767_v40, 4 }
 0x37e   : > { %v762_v42 = vadd.f32 %v761_v11, %v760_v39  ;;  %v769_v43 = vmax.f32 %v767_v40, %v768_v41 }
 0x380   : > { %v763_v44 = vrot.slane %v762_v42, 2  ;;  %v770_v45 = vrot.slane %v769_v43, 2 }
 0x382   : > { %v764_v46 = vadd.f32 %v763_v44, %v762_v42  ;;  %v771_v47 = vmax.f32 %v769_v43, %v770_v45 }
 0x384   : > { %v765_v48 = vrot.slane %v764_v46, 1  ;;  %v772_v49 = vrot.slane %v771_v47, 1 }
 0x386   : > { %v766_v50 = vadd.f32 %v765_v48, %v764_v46  ;;  %v773_v51 = vmax.f32 %v771_v47, %v772_v49 }
 0x388   : > { %v774_v52 = vmul.f32 %v773_v51, %v766_v50 }
 0x38a   : > { %775 = vst [vmem:[%s356_s25] sm:$0x1] %v774_v52 }
 0x38b   : > { %1092 = shalt.err (!%p1089_p3)
}
 0x38c   : > { %1013 = dma.vmem_to_hbm [thread:$0]  (%p1221_p5), %s788_s27, 16, %s790_s28, %s777_s29  }
 0x38d PF: > { %p1019_p4 = scmp.ge.s32.totalorder %s1127_s14, 2  ;;  %s801_s18 = sand.u32 1, %s1115_s11  }
 0x38e   : > { %s802_s23 = scalar_lea.sflag [#allocation4], %s801_s18 }
 0x38f   : > { %p1016_p7 = pnand %p1019_p4, %p1225_p6 }
 0x391   : > { %p1017_p8 = pneg %p1016_p7 }
 0x393   : > { %1110 = dma.done.wait (%p1017_p8), %s802_s23, 16  }
 0x394   : > { %1112 = vsyncadd (%p1017_p8), %s802_s23, 4294967280  ;;  %p21_p9 = scmp.ge.s32.totalorder %s1208_s16, 6   ;;  %s1374_s11 = smov %s1119_s12 }
 0x395   : > { %s1375_s12 = smov %s1123_s13  ;;  %s1376_s13 = smov %s1219_s19 }
 0x396   : > { %s1377_s14 = smov %s1208_s16  ;;  %23 = sbr.rel (!%p21_p9) target bundleno = 6 (0x6), region = 97 }
 0x39b   :  { %807 = vsyncpa [#allocation4], 1 }
 0x39c   :  { %809 = vsyncpa [#allocation4 + $0x1], 1 }

</bundles_post_ra>
